<compile_context>
chip_gen: v7x
topology: tpu7x:2x2x1
jax: 0.10.0
libtpu: 0.0.40
codegen_flags: <defaults>
</compile_context>

<pallas_src>
import jax
import jax.numpy as jnp
from jax import lax
from jax.experimental import pallas as pl
from jax.experimental.pallas import tpu as pltpu


def _round_up(x, m):
    return ((x + m - 1) // m) * m


def _masked_ce_kernel(y_ref, yhat_ref, out_ref):
    """One grid step: a (b_tile, C, t_tile) logits slab in native (B, C, T) layout.

    T sits on lanes, C on sublanes.  Writes the summed token loss of this block
    into its own (1, 1) output cell (no cross-step accumulator).
    """
    y = y_ref[...]                                       # (bt, tt) int32
    logits = yhat_ref[...].astype(jnp.float32)           # (bt, C, tt)

    # Wrapper pads ragged B/T edges with target == -1; those tokens are
    # excluded.  The module's own "padding" (y == 0) *does* contribute
    # (log C on zeroed logits), exactly like nn.CrossEntropyLoss on masked_yhat.
    valid = y >= 0                                       # (bt, tt) bool
    y_cls = jnp.where(valid, y, 0)                       # safe class ids
    mask = (y_cls != 0).astype(jnp.float32)              # module's mask

    masked = logits * mask[:, None, :]                   # (bt, C, tt)

    # Stable log-sum-exp over the class (sublane) axis.
    m = jnp.max(masked, axis=1, keepdims=True)           # (bt, 1, tt)
    lse = m + jnp.log(jnp.sum(jnp.exp(masked - m), axis=1, keepdims=True))

    # Gather the target-class logit via one-hot compare + class-axis reduce.
    cls = lax.broadcasted_iota(jnp.int32, masked.shape, 1)
    tgt = jnp.sum(jnp.where(cls == y_cls[:, None, :], masked, 0.0),
                  axis=1, keepdims=True)                 # (bt, 1, tt)

    per_tok = (lse - tgt)[:, 0, :]                       # (bt, tt)
    per_tok = jnp.where(valid, per_tok, 0.0)

    partial = jnp.sum(per_tok, axis=-1, keepdims=True)        # lane reduce -> (bt, 1)
    out_ref[...] = jnp.sum(partial, axis=0, keepdims=True)    # sublane reduce -> (1, 1)


def custom_cross_entropy_loss(yhat, y, *, b_tile=8, t_tile=512):
    """yhat: (B, C, T) float logits (f32 or bf16), y: (B, T) int targets -> scalar loss."""
    B, C, T = yhat.shape
    y = y.astype(jnp.int32)

    # Tokens-on-lanes: the T tile must be a multiple of 128 lanes.
    t_eff = min(_round_up(t_tile, 128), _round_up(T, 128))
    # Batch tile: either the full batch (any size) or a multiple of 8 sublanes
    # (so the int32 target block (b_eff, t_eff) satisfies the (8, 128) rule).
    if B <= b_tile:
        b_eff = B
    else:
        b_eff = max(8, (b_tile // 8) * 8)

    B_pad = _round_up(B, b_eff)
    T_pad = _round_up(T, t_eff)
    if B_pad != B or T_pad != T:
        yhat = jnp.pad(yhat, ((0, B_pad - B), (0, 0), (0, T_pad - T)))
        y = jnp.pad(y, ((0, B_pad - B), (0, T_pad - T)), constant_values=-1)

    grid = (B_pad // b_eff, T_pad // t_eff)

    partials = pl.pallas_call(
        _masked_ce_kernel,
        out_shape=jax.ShapeDtypeStruct(grid, jnp.float32),
        grid_spec=pltpu.PrefetchScalarGridSpec(
            num_scalar_prefetch=0,
            grid=grid,
            in_specs=[
                pl.BlockSpec((b_eff, t_eff), lambda i, j: (i, j)),        # targets
                pl.BlockSpec((b_eff, C, t_eff), lambda i, j: (i, 0, j)),  # logits, native layout
            ],
            out_specs=pl.BlockSpec((1, 1), lambda i, j: (i, j)),          # per-block partial sums
        ),
        compiler_params=pltpu.CompilerParams(
            dimension_semantics=("parallel", "parallel"),
        ),
    )(y, yhat)

    # Mean over all B*T tokens (nn.CrossEntropyLoss default reduction).
    return jnp.sum(partials) / jnp.float32(B * T)


def _reference_loss(yhat, y):
    """Plain-JAX reference mirroring the PyTorch module."""
    mask = (y != 0).astype(yhat.dtype)                       # (B, T)
    masked_yhat = yhat * mask[:, None, :]                    # (B, C, T)
    B, C, T = yhat.shape
    logits = jnp.transpose(masked_yhat, (0, 2, 1)).reshape(B * T, C)
    tgt = y.reshape(B * T).astype(jnp.int32)                 # masked_y == y
    logp = jax.nn.log_softmax(logits.astype(jnp.float32), axis=-1)
    return -jnp.mean(logp[jnp.arange(B * T), tgt])


def _check(yhat, y):
    loss = jax.block_until_ready(custom_cross_entropy_loss(yhat, y))
    ref = jax.block_until_ready(_reference_loss(yhat, y))
    assert jnp.allclose(loss, ref, rtol=1e-5, atol=1e-5), (loss, ref)


if __name__ == "__main__":
    key = jax.random.PRNGKey(0)

    # Case 1: the small canonical shape (batch=2, tag classes=16, seq len=8).
    k1, k2, key = jax.random.split(key, 3)
    B, C, T = 2, 16, 8
    yhat = jax.random.normal(k1, (B, C, T), dtype=jnp.float32)
    y = jax.random.randint(k2, (B, T), minval=0, maxval=C, dtype=jnp.int32)
    y = y.at[:, -3:].set(0)          # padded tail positions (module semantics)
    _check(yhat, y)

    # Case 2: ragged batch/seq sizes -> exercises wrapper padding + valid mask.
    k1, k2, key = jax.random.split(key, 3)
    B, C, T = 5, 16, 37
    yhat = jax.random.normal(k1, (B, C, T), dtype=jnp.float32)
    y = jax.random.randint(k2, (B, T), minval=0, maxval=C, dtype=jnp.int32)
    y = y.at[:, -5:].set(0)
    _check(yhat, y)

    # Case 3: multiple grid steps over batch (batch tiling + parallel grid).
    k1, k2, key = jax.random.split(key, 3)
    B, C, T = 16, 16, 300
    yhat = jax.random.normal(k1, (B, C, T), dtype=jnp.float32)
    y = jax.random.randint(k2, (B, T), minval=0, maxval=C, dtype=jnp.int32)
    y = y.at[:, -40:].set(0)
    _check(yhat, y)

    print("KERNEL_OK")
</pallas_src>

<mosaic_0001>
module attributes {stable_mosaic.version = 11 : i64} {
  func.func @_masked_ce_kernel(%arg0: i32, %arg1: i32, %arg2: memref<2x128xi32, #tpu.memory_space<vmem>>, %arg3: memref<2x16x128xf32, #tpu.memory_space<vmem>>, %arg4: memref<1x1xf32, #tpu.memory_space<vmem>>) attributes {dimension_semantics = [#tpu.dimension_semantics<parallel>, #tpu.dimension_semantics<parallel>], iteration_bounds = array<i64: 1, 1>, scalar_prefetch = 0 : i64, scratch_operands = 0 : i64, tpu.core_type = #tpu.core_type<tc>, window_params = [{transform_indices = @transform_0, window_bounds = array<i64: 2, 128>}, {transform_indices = @transform_1, window_bounds = array<i64: 2, 16, 128>}, {transform_indices = @transform_2, window_bounds = array<i64: 1, 1>}]} {
    %c0 = arith.constant 0 : index
    %c0_0 = arith.constant 0 : index
    %0 = vector.load %arg2[%c0, %c0_0] : memref<2x128xi32, #tpu.memory_space<vmem>>, vector<2x128xi32>
    %c0_1 = arith.constant 0 : index
    %c0_2 = arith.constant 0 : index
    %c0_3 = arith.constant 0 : index
    %1 = vector.load %arg3[%c0_1, %c0_2, %c0_3] : memref<2x16x128xf32, #tpu.memory_space<vmem>>, vector<2x16x128xf32>
    %c0_i32 = arith.constant 0 : i32
    %2 = vector.broadcast %c0_i32 : i32 to vector<2x128xi32>
    %3 = arith.cmpi sge, %0, %2 : vector<2x128xi32>
    %c0_i32_4 = arith.constant 0 : i32
    %4 = vector.broadcast %c0_i32_4 : i32 to vector<2x128xi32>
    %5 = arith.select %3, %0, %4 : vector<2x128xi1>, vector<2x128xi32>
    %c0_i32_5 = arith.constant 0 : i32
    %6 = vector.broadcast %c0_i32_5 : i32 to vector<2x128xi32>
    %7 = arith.cmpi ne, %5, %6 : vector<2x128xi32>
    %8 = arith.extui %7 : vector<2x128xi1> to vector<2x128xi32>
    %9 = arith.sitofp %8 : vector<2x128xi32> to vector<2x128xf32>
    %10 = vector.shape_cast %9 : vector<2x128xf32> to vector<2x1x128xf32>
    %11 = vector.broadcast %10 : vector<2x1x128xf32> to vector<2x16x128xf32>
    %12 = arith.mulf %1, %11 : vector<2x16x128xf32>
    %cst = arith.constant dense<0xFF800000> : vector<2x128xf32>
    %13 = vector.multi_reduction <maximumf>, %12, %cst [1] : vector<2x16x128xf32> to vector<2x128xf32>
    %14 = vector.shape_cast %13 : vector<2x128xf32> to vector<2x1x128xf32>
    %15 = vector.broadcast %14 : vector<2x1x128xf32> to vector<2x16x128xf32>
    %16 = arith.subf %12, %15 : vector<2x16x128xf32>
    %17 = math.exp %16 : vector<2x16x128xf32>
    %cst_6 = arith.constant dense<0.000000e+00> : vector<2x128xf32>
    %18 = vector.multi_reduction <add>, %17, %cst_6 [1] : vector<2x16x128xf32> to vector<2x128xf32>
    %19 = vector.shape_cast %18 : vector<2x128xf32> to vector<2x1x128xf32>
    %20 = math.log %19 : vector<2x1x128xf32>
    %21 = arith.addf %14, %20 : vector<2x1x128xf32>
    %22 = tpu.iota {dimensions = array<i32: 1>} : vector<2x16x128xi32>
    %23 = vector.shape_cast %5 : vector<2x128xi32> to vector<2x1x128xi32>
    %24 = vector.broadcast %23 : vector<2x1x128xi32> to vector<2x16x128xi32>
    %25 = arith.cmpi eq, %22, %24 : vector<2x16x128xi32>
    %cst_7 = arith.constant 0.000000e+00 : f32
    %26 = vector.broadcast %cst_7 : f32 to vector<2x16x128xf32>
    %27 = arith.select %25, %12, %26 : vector<2x16x128xi1>, vector<2x16x128xf32>
    %cst_8 = arith.constant dense<0.000000e+00> : vector<2x128xf32>
    %28 = vector.multi_reduction <add>, %27, %cst_8 [1] : vector<2x16x128xf32> to vector<2x128xf32>
    %29 = vector.shape_cast %28 : vector<2x128xf32> to vector<2x1x128xf32>
    %30 = arith.subf %21, %29 : vector<2x1x128xf32>
    %31 = vector.shape_cast %30 : vector<2x1x128xf32> to vector<2x128xf32>
    %cst_9 = arith.constant 0.000000e+00 : f32
    %32 = vector.broadcast %cst_9 : f32 to vector<2x128xf32>
    %33 = arith.select %3, %31, %32 : vector<2x128xi1>, vector<2x128xf32>
    %cst_10 = arith.constant dense<0.000000e+00> : vector<2xf32>
    %34 = vector.multi_reduction <add>, %33, %cst_10 [1] : vector<2x128xf32> to vector<2xf32>
    %35 = vector.shape_cast %34 : vector<2xf32> to vector<2x1xf32>
    %cst_11 = arith.constant dense<0.000000e+00> : vector<1xf32>
    %36 = vector.multi_reduction <add>, %35, %cst_11 [0] : vector<2x1xf32> to vector<1xf32>
    %37 = vector.shape_cast %36 : vector<1xf32> to vector<1x1xf32>
    %c0_12 = arith.constant 0 : index
    %c0_13 = arith.constant 0 : index
    %38 = vector.load %arg4[%c0_12, %c0_13] : memref<1x1xf32, #tpu.memory_space<vmem>>, vector<1x1xf32>
    tpu.vector_store %arg4[%c0_12, %c0_13], %37 {strides = array<i32>} : memref<1x1xf32, #tpu.memory_space<vmem>>, vector<1x1xf32>,
    return
  }
  func.func @transform_0(%arg0: i32, %arg1: i32) -> (i32, i32) {
    %c0_i32 = arith.constant 0 : i32
    return %arg0, %arg1 : i32, i32
  }
  func.func @transform_1(%arg0: i32, %arg1: i32) -> (i32, i32, i32) {
    %c0_i32 = arith.constant 0 : i32
    %c0_i32_0 = arith.constant 0 : i32
    return %arg0, %c0_i32, %arg1 : i32, i32, i32
  }
  func.func @transform_2(%arg0: i32, %arg1: i32) -> (i32, i32) {
    %c0_i32 = arith.constant 0 : i32
    return %arg0, %arg1 : i32, i32
  }
}

</mosaic_0001>

<bundles_post_ra>
// kernel: tpu_custom_call.1
= control target key start
LH: loop header
LB: loop body
LE: loop exit
PB: predicated region body
PF: predicated region fallthrough
CT: control target
= control target key end

     0   :  { %7 = vsyncpa [#allocation3], 0  ;;  %s405_s0 = inlined_call_operand.hbm [shape: s32[2,128], index: 0, kind: input, shape index: {}]   ;;  %s406_s1 = inlined_call_operand.hbm [shape: f32[2,16,128], index: 1, kind: input, shape index: {}]   ;;  %s407_s2 = inlined_call_operand.hbm [shape: f32[1,1], index: 2, kind: output, shape index: {}]  }
   0x1   :  { %8 = vsyncpa [#allocation6], 0 }
   0x2   :  { %9 = vsyncpa [#allocation4], 0  ;;  %s315_s9 = smov [#allocation2]   ;;  %s316_s11 = smov [#allocation5]  }
   0x3   :  { %s16_s10 = sshll.u32 %s315_s9, 4  ;;  %s25_s12 = sshll.u32 %s316_s11, 4  ;;  %s17_s10 = int_to_ptr.vmem [resolvable:$true] %s16_s10  ;;  %s337_s12 = int_to_ptr.vmem [resolvable:$true] %s25_s12 }
   0x4   :  { %s243_s15 = scalar_lea.hbm %s405_s0, 32 }
   0x5   :  { %p244_p0 = scmp.ne.s32.totalorder %s405_s0, %s243_s15  ;;  %p247_p1 = scmp.lt.u32.totalorder %s243_s15, %s405_s0 }
   0x7   :  { %p249_p2 = pnand %p247_p1, %p244_p0 }
   0x9   :  { %252 = shalt.err (!%p249_p2)
}
   0xa   :  { %s253_s20 = scalar_lea.vmem %s17_s10, 32  ;;  %p258_p4 = scmp.lt.s32.totalorder %s17_s10, %s17_s10 }
   0xb   :  { %p254_p3 = scmp.ne.s32.totalorder %s17_s10, %s253_s20  ;;  %p259_p5 = scmp.lt.s32.totalorder %s253_s20, %s253_s20 }
   0xd   :  { %p260_p6 = por %p259_p5, %p258_p4 }
   0xf   :  { %p261_p7 = pnand %p260_p6, %p254_p3 }
  0x11   :  { %264 = shalt.err (!%p261_p7)
}
  0x12   :  { %19 = dma.hbm_to_vmem [thread:$0]  %s405_s0, 32, %s17_s10, [#allocation3]  }
  0x13   :  { %s265_s25 = scalar_lea.hbm %s406_s1, 512 }
  0x14   :  { %p266_p8 = scmp.ne.s32.totalorder %s406_s1, %s265_s25  ;;  %p269_p9 = scmp.lt.u32.totalorder %s265_s25, %s406_s1 }
  0x16   :  { %p271_p10 = pnand %p269_p9, %p266_p8 }
  0x18   :  { %274 = shalt.err (!%p271_p10)
}
  0x19   :  { %s275_s30 = scalar_lea.vmem %s337_s12, 512  ;;  %p280_p12 = scmp.lt.s32.totalorder %s337_s12, %s337_s12 }
  0x1a   :  { %p276_p11 = scmp.ne.s32.totalorder %s337_s12, %s275_s30  ;;  %p281_p13 = scmp.lt.s32.totalorder %s275_s30, %s275_s30 }
  0x1c   :  { %p282_p0 = por %p281_p13, %p280_p12 }
  0x1e   :  { %p283_p1 = pnand %p282_p0, %p276_p11 }
  0x20   :  { %286 = shalt.err (!%p283_p1)
}
  0x21   :  { %s317_s0 = smov 128   ;;  %s318_s3 = smov 8  }
  0x22   :  { %31 = dma.hbm_to_vmem [thread:$0]  %s406_s1, 512, %s337_s12, [#allocation6], %s317_s0, %s317_s0, %s318_s3  }
  0x23   :  { %309 = dma.done.wait [#allocation3], 32  }
  0x24   :  { %310 = vsyncadd [#allocation3], 4294967264 }
  0x25   :  { %311 = dma.done.wait [#allocation6], 512  }
  0x26   :  { %312 = vsyncadd [#allocation6], 4294966784  ;;  %v52_v0 = vlaneseq  ;;  %v319_v1 = vmov 1966171168   ;;  %v370_v5 = vld [vmem:[#allocation2] sm:$0x3] }
  0x27   :  { %v50_v2 = vunpack.c.l.s4 %v319_v1  ;;  %vm43_vm0 = vcmp.ge.s32.totalorder %v370_v5, 0  ;;  %v320_v8 = vmov 0.0   ;;  %v39_v14 = vld [vmem:[#allocation5] sm:$0xff]  ;;  %v40_v15 = vld [vmem:[#allocation5 + $0x8] sm:$0xff]  ;;  %v41_v18 = vld [vmem:[#allocation5 + $0x10] sm:$0xff]  ;;  %vm190_vm6 = vcmask 1041409  }
  0x28   :  { %v368_v4 = vshrl.u32 %v52_v0, 7  ;;  %v44_v7 = vsel %vm43_vm0, %v370_v5, 0  ;;  %v42_v19 = vld [vmem:[#allocation5 + $0x18] sm:$0xff]  ;;  %vm194_vm7 = vcmask 1041408   ;;  %s321_s1 = smov [#allocation7]   ;;  %vm205_vm8 = vcmask 0  }
  0x29   :  { %v51_v3 = vunpack.c.0.s8 %v50_v2  ;;  %vm45_vm1 = vcmp.ne.s32.totalorder %v44_v7, 0  ;;  %s213_s6 = sshll.u32 %s321_s1, 4  ;;  %s214_s6 = int_to_ptr.vmem [resolvable:$true] %s213_s6 }
  0x2a   :  { %v223_v9 = vsel %vm45_vm1, 1.0, %v320_v8  ;;  %v73_v11 = vsub.s32 0, %v368_v4  ;;  %v133_v51 = vadd.s32 8, %v368_v4  ;;  %s287_s7 = scalar_lea.vmem %s214_s6, 16  ;;  %s291_s8 = scalar_lea.vmem %s214_s6, 32 }
  0x2b   :  { %v54_v6 = vsub.s32 %v51_v3, %v368_v4  ;;  %p288_p2 = scmp.ne.s32.totalorder %s214_s6, %s287_s7  ;;  %p292_p3 = scmp.lt.s32.totalorder %s214_s6, %s214_s6 }
  0x2c   :  { %p293_p4 = scmp.lt.s32.totalorder %s291_s8, %s287_s7 }
  0x2d   :  { %v55_v10 = vrot.slane %v223_v9, %v54_v6  ;;  %v140_v36 = vrot.slane %v44_v7, %v54_v6 }
  0x2e   :  { %p294_p5 = por %p293_p4, %p292_p3 }
  0x2f   :  { %v56_v12 = vcombine.high %v55_v10, %v55_v10  ;;  %v63_v13 = vrot.slane %v55_v10, %v54_v6  ;;  %v141_v42 = vcombine.high %v140_v36, %v140_v36  ;;  %v148_v47 = vrot.slane %v140_v36, %v54_v6 }
  0x30   :  { %p295_p6 = pnand %p294_p5, %p288_p2 }
  0x31   :  { %v70_v16 = vrot.slane %v56_v12, %v54_v6  ;;  %v74_v17 = vrot.slane %v63_v13, %v73_v11  ;;  %v155_v50 = vrot.slane %v141_v42, %v54_v6  ;;  %v159_v52 = vrot.slane %v148_v47, %v73_v11 }
  0x33   :  { %v78_v20 = vrot.slane %v70_v16, %v73_v11  ;;  %v81_v21 = vmul.f32 %v74_v17, %v39_v14  ;;  %v82_v22 = vmul.f32 %v74_v17, %v40_v15  ;;  %v163_v53 = vrot.slane %v155_v50, %v73_v11 }
  0x34   :  { %vm164_vm2 = vcmp.eq.s32.totalorder %v368_v4, %v159_v52  ;;  %vm165_vm3 = vcmp.eq.s32.totalorder %v133_v51, %v159_v52 }
  0x35   :  { %v83_v23 = vmul.f32 %v78_v20, %v41_v18  ;;  %v84_v24 = vmul.f32 %v78_v20, %v42_v19  ;;  %v85_v25 = vmax.f32 %v81_v21, %v82_v22  ;;  %vm166_vm4 = vcmp.eq.s32.totalorder %v368_v4, %v163_v53 }
  0x36   :  { %vm167_vm5 = vcmp.eq.s32.totalorder %v133_v51, %v163_v53  ;;  %v168_v55 = vsel %vm164_vm2, %v81_v21, 0.0  ;;  %v169_v56 = vsel %vm165_vm3, %v82_v22, 0.0 }
  0x37   :  { %v86_v26 = vrot.slane %v85_v25, 4  ;;  %v92_v27 = vmax.f32 %v83_v23, %v84_v24  ;;  %v170_v60 = vsel %vm166_vm4, %v83_v23, 0.0  ;;  %v171_v61 = vsel %vm167_vm5, %v84_v24, 0.0 }
  0x38   :  { %v172_v63 = vadd.f32 %v169_v56, %v168_v55  ;;  %v179_v2 = vadd.f32 %v171_v61, %v170_v60 }
  0x39   :  { %v87_v28 = vmax.f32 %v85_v25, %v86_v26  ;;  %v93_v29 = vrot.slane %v92_v27, 4 }
  0x3a   :  { %v173_v7 = vrot.slane %v172_v63, 4  ;;  %v180_v4 = vrot.slane %v179_v2, 4 }
  0x3b   :  { %v88_v30 = vrot.slane %v87_v28, 2  ;;  %v94_v31 = vmax.f32 %v92_v27, %v93_v29 }
  0x3c   :  { %v174_v12 = vadd.f32 %v173_v7, %v172_v63  ;;  %v181_v15 = vadd.f32 %v180_v4, %v179_v2 }
  0x3d   :  { %v89_v32 = vmax.f32 %v87_v28, %v88_v30  ;;  %v95_v33 = vrot.slane %v94_v31, 2 }
  0x3e   :  { %v175_v18 = vrot.slane %v174_v12, 2  ;;  %v182_v20 = vrot.slane %v181_v15, 2 }
  0x3f   :  { %v90_v34 = vrot.slane %v89_v32, 1  ;;  %v96_v35 = vmax.f32 %v94_v31, %v95_v33 }
  0x41   :  { %v378_v37 = vmax.f32 %v89_v32, %v90_v34  ;;  %v97_v38 = vrot.slane %v96_v35, 1 }
  0x43   :  { %v380_v39 = vmax.f32 %v96_v35, %v97_v38  ;;  %v99_v40 = vsub.f32 %v81_v21, %v378_v37  ;;  %v100_v41 = vsub.f32 %v82_v22, %v378_v37  ;;  %v176_v21 = vadd.f32 %v175_v18, %v174_v12 }
  0x44   :  { %v183_v22 = vadd.f32 %v182_v20, %v181_v15 }
  0x45   :  { %v101_v43 = vsub.f32 %v83_v23, %v380_v39  ;;  %v102_v44 = vsub.f32 %v84_v24, %v380_v39  ;;  %v103_v45 = vmul.f32 1.442695, %v99_v40  ;;  %v105_v46 = vmul.f32 1.442695, %v100_v41 }
  0x46   :  { %v177_v23 = vrot.slane %v176_v21, 1  ;;  %v184_v24 = vrot.slane %v183_v22, 1 }
  0x47   :  { %231 = vpow2.f32 %v103_v45  ;;  %v107_v48 = vmul.f32 1.442695, %v101_v43  ;;  %v109_v49 = vmul.f32 1.442695, %v102_v44 }
  0x48   :  { %233 = vpow2.f32 %v105_v46  ;;  %v178_v27 = vadd.f32 %v177_v23, %v176_v21  ;;  %v185_v31 = vadd.f32 %v184_v24, %v183_v22 }
  0x49   :  { %235 = vpow2.f32 %v107_v48 }
  0x4a   :  { %237 = vpow2.f32 %v109_v49 }
  0x51   :  { %v232_v54 = vpop.eup %231 }
  0x52   :  { %v234_v57 = vpop.eup %233 }
  0x53   :  { %v236_v58 = vpop.eup %235  ;;  %v111_v59 = vadd.f32 %v234_v57, %v232_v54 }
  0x54   :  { %v238_v62 = vpop.eup %237 }
  0x55   :  { %v112_v0 = vrot.slane %v111_v59, 4  ;;  %v118_v1 = vadd.f32 %v238_v62, %v236_v58 }
  0x57   :  { %v113_v3 = vadd.f32 %v112_v0, %v111_v59  ;;  %v119_v6 = vrot.slane %v118_v1, 4 }
  0x59   :  { %v114_v8 = vrot.slane %v113_v3, 2  ;;  %v120_v9 = vadd.f32 %v119_v6, %v118_v1 }
  0x5b   :  { %v115_v10 = vadd.f32 %v114_v8, %v113_v3  ;;  %v121_v11 = vrot.slane %v120_v9, 2 }
  0x5d   :  { %v116_v13 = vrot.slane %v115_v10, 1  ;;  %v122_v14 = vadd.f32 %v121_v11, %v120_v9 }
  0x5f   :  { %v117_v16 = vadd.f32 %v116_v13, %v115_v10  ;;  %v123_v17 = vrot.slane %v122_v14, 1 }
  0x61   :  { %v124_v19 = vadd.f32 %v123_v17, %v122_v14  ;;  %239 = vlog2.f32 %v117_v16 }
  0x63   :  { %241 = vlog2.f32 %v124_v19 }
  0x6b   :  { %v240_v25 = vpop.eup %239 }
  0x6c   :  { %v126_v26 = vmul.f32 0.6931472, %v240_v25 }
  0x6d   :  { %v242_v28 = vpop.eup %241 }
  0x6e   :  { %v128_v29 = vmul.f32 0.6931472, %v242_v28  ;;  %v129_v30 = vadd.f32 %v126_v26, %v378_v37 }
  0x70   :  { %v130_v32 = vadd.f32 %v128_v29, %v380_v39  ;;  %v186_v33 = vsub.f32 %v129_v30, %v178_v27 }
  0x72   :  { %v187_v34 = vsub.f32 %v130_v32, %v185_v31 }
  0x74   :  { %v191_v35 = vsel %vm190_vm6, %v187_v34, %v186_v33 }
  0x75   :  { %v193_v36 = vsel %vm43_vm0, %v191_v35, 0.0 }
  0x76   :  { %v195_v38 = vsel %vm194_vm7, %v193_v36, 0.0 }
  0x77   :  { %196 = vadd.xlane.f32.xlu0 %v195_v38 }
 0x104   :  { %v197_v40 = vpop.xlane.xlu0 %196 }
 0x105   :  { %v198_v41 = vsel %vm194_vm7, %v197_v40, 0.0 }
 0x106   :  { %v199_v42 = vrot.slane %v198_v41, 4 }
 0x108   :  { %v200_v43 = vadd.f32 %v199_v42, %v198_v41 }
 0x10a   :  { %v201_v44 = vrot.slane %v200_v43, 2 }
 0x10c   :  { %v202_v45 = vadd.f32 %v201_v44, %v200_v43 }
 0x10e   :  { %v203_v37 = vrot.slane %v202_v45, 1 }
 0x110   :  { %v204_v39 = vadd.f32 %v203_v37, %v202_v45 }
 0x112   :  { %206 = vst.msk [vmem:[#allocation7] sm:$0x1] %vm205_vm8, %v204_v39 }
 0x113   :  { %298 = shalt.err (!%p295_p6)
}
 0x114   :  { %s299_s11 = scalar_lea.hbm %s407_s2, 16 }
 0x115   :  { %p300_p7 = scmp.ne.s32.totalorder %s407_s2, %s299_s11  ;;  %p303_p8 = scmp.lt.u32.totalorder %s299_s11, %s407_s2 }
 0x117   :  { %p305_p9 = pnand %p303_p8, %p300_p7 }
 0x119   :  { %308 = shalt.err (!%p305_p9)
}
 0x11a   :  { %216 = dma.vmem_to_hbm [thread:$0]  %s214_s6, 16, %s407_s2, [#allocation4]  }
 0x11b   :  { %313 = dma.done.wait [#allocation4], 16  }
 0x11c   :  { %314 = vsyncadd [#allocation4], 4294967280 }
 0x11d   :  { %220 = vsyncpa [#allocation3], 1 }
 0x11e   :  { %221 = vsyncpa [#allocation6], 1 }
 0x11f   :  { %222 = vsyncpa [#allocation4], 1 }

</bundles_post_ra>
